<compile_context>
chip_gen: v5e
topology: v5e:2x2
jax: 0.10.0
libtpu: 0.0.40
codegen_flags: <defaults>
</compile_context>

<pallas_src>
import jax
import jax.numpy as jnp
from jax import lax
from jax.experimental import pallas as pl
from jax.experimental.pallas import tpu as pltpu


# ------------------------------------------------------------------ constants
_ONE_HOT_MAX_VOCAB = 1024                     # one-hot MXU gather viable for small V
_RESIDENT_TABLE_MAX_BYTES = 16 * 1024 * 1024  # conservative across v5e / v6e / v7x
_DMA_GATHER_BUFFERS = 8                       # outstanding row DMAs (huge-vocab path)


def _pick_token_tile(n_tokens):
    """Tokens per grid step: multiple of 128 (sublane- and lane-friendly)."""
    if n_tokens >= 512:
        return 512
    if n_tokens >= 256:
        return 256
    return 128


def _vmem_limit(need_bytes):
    """Explicit scoped-VMEM limit with headroom, capped below v7x's 64 MiB."""
    return int(min(max(need_bytes + (8 << 20), 16 << 20), 48 << 20))


def _split_to_bf16x3(table):
    """Split a float table into three bf16 planes with hi+mid+lo == f32(table).

    Done once in the wrapper (plain XLA ops).  Each bf16 plane multiplied by an
    exact 0/1 one-hot on the MXU is exact in the f32 accumulator, so the sum of
    the three matmuls reproduces the f32 lookup to <=1 ulp.
    """
    t32 = table.astype(jnp.float32)
    hi = t32.astype(jnp.bfloat16)
    r1 = t32 - hi.astype(jnp.float32)
    mid = r1.astype(jnp.bfloat16)
    lo = (r1 - mid.astype(jnp.float32)).astype(jnp.bfloat16)
    return hi, mid, lo


# ------------------------------------------------------------------- kernels
def _onehot_embed_kernel(ids_ref, hi_ref, mid_ref, lo_ref, out_ref):
    """Tiny-vocab path: exact (T, V) one-hot @ bf16-split table on the MXU.

    ids_ref           : (T, 1) int32 VMEM tile of token ids
    hi/mid/lo_ref     : (V, D) bf16 table planes, VMEM-resident (constant map)
    out_ref           : (T, D) sublane/lane-dense output tile
    """
    ids = ids_ref[...]                                     # (T, 1) int32
    t_tile = ids.shape[0]
    v = hi_ref.shape[0]
    col = lax.broadcasted_iota(jnp.int32, (t_tile, v), 1)  # lane iota
    onehot = (ids == col).astype(jnp.bfloat16)             # (T, V), exact in bf16
    acc = jnp.dot(onehot, hi_ref[...], preferred_element_type=jnp.float32)
    acc += jnp.dot(onehot, mid_ref[...], preferred_element_type=jnp.float32)
    acc += jnp.dot(onehot, lo_ref[...], preferred_element_type=jnp.float32)
    out_ref[...] = acc.astype(out_ref.dtype)


def _resident_gather_kernel(ids_smem, emb_ref, out_ref):
    """Medium-vocab path: per-token row copy from the VMEM-resident table.

    ids_smem: (N_pad,) int32 scalar-prefetched token ids (SMEM)
    emb_ref : (V, D) table, VMEM-resident (constant index_map)
    out_ref : (T, D) output tile for this grid step
    """
    t_tile = out_ref.shape[0]
    base = pl.program_id(0) * t_tile

    def copy_row(t, carry):
        tok = ids_smem[base + t]                        # scalar SMEM read
        out_ref[pl.ds(t, 1), :] = emb_ref[pl.ds(tok, 1), :]
        return carry

    lax.fori_loop(0, t_tile, copy_row, 0)


def _dma_gather_kernel(ids_smem, emb_hbm, out_ref, gbuf, sems):
    """Huge-vocab path: manual multi-in-flight row-DMA gather from HBM.

    ids_smem: (N_pad,) int32 scalar-prefetched token ids (SMEM)
    emb_hbm : (V, D) table left in HBM (memory_space=pl.ANY)
    out_ref : (T, D) output tile
    gbuf    : (T, D) VMEM gather buffer (scratch)
    sems    : (_DMA_GATHER_BUFFERS,) revolving DMA semaphores
    """
    t_tile = out_ref.shape[0]
    nbuf = _DMA_GATHER_BUFFERS
    assert t_tile >= nbuf  # static; token tiles are always >= 128
    base = pl.program_id(0) * t_tile

    def start_row(t):
        tok = ids_smem[base + t]
        pltpu.make_async_copy(
            emb_hbm.at[pl.ds(tok, 1)],          # (1, D) HBM row
            gbuf.at[pl.ds(t, 1)],               # (1, D) VMEM slot
            sems.at[t & (nbuf - 1)],
        ).start()

    # Prime the pipeline with nbuf outstanding row DMAs.
    for t in range(nbuf):
        start_row(t)

    @pl.loop(0, t_tile)
    def _(t):
        slot = t & (nbuf - 1)
        # Wait for the row-t DMA (same transfer size; sem slot t % nbuf).
        pltpu.make_async_copy(
            emb_hbm.at[pl.ds(0, 1)],
            gbuf.at[pl.ds(t, 1)],
            sems.at[slot],
        ).wait()

        # Keep nbuf row DMAs in flight.
        @pl.when(t + nbuf < t_tile)
        def _():
            start_row(t + nbuf)

    out_ref[...] = gbuf[...]                    # one dense (T, D) store


# ------------------------------------------------------------------ wrappers
def _embed_onehot(flat_ids_padded, emb_table, t_tile):
    n_pad = flat_ids_padded.shape[0]
    v, d = emb_table.shape
    es = emb_table.dtype.itemsize
    hi, mid, lo = _split_to_bf16x3(emb_table)
    need = (2 * t_tile * 4              # id tiles
            + 6 * v * d * 2             # three resident bf16 planes, double-buffered
            + 2 * t_tile * d * es       # output tiles
            + 8 * t_tile * v)           # iota / one-hot temporaries
    return pl.pallas_call(
        _onehot_embed_kernel,
        out_shape=jax.ShapeDtypeStruct((n_pad, d), emb_table.dtype),
        grid=(n_pad // t_tile,),
        in_specs=[
            pl.BlockSpec((t_tile, 1), lambda i: (i, 0)),     # token-id tile
            pl.BlockSpec((v, d), lambda i: (0, 0)),          # hi plane, resident
            pl.BlockSpec((v, d), lambda i: (0, 0)),          # mid plane, resident
            pl.BlockSpec((v, d), lambda i: (0, 0)),          # lo plane, resident
        ],
        out_specs=pl.BlockSpec((t_tile, d), lambda i: (i, 0)),
        compiler_params=pltpu.CompilerParams(
            dimension_semantics=("parallel",),               # megacore sharding
            vmem_limit_bytes=_vmem_limit(need),
        ),
    )(flat_ids_padded.reshape(n_pad, 1), hi, mid, lo)


def _embed_resident_gather(flat_ids_padded, emb_table, t_tile):
    n_pad = flat_ids_padded.shape[0]
    v, d = emb_table.shape
    es = emb_table.dtype.itemsize
    need = 2 * v * d * es + 2 * t_tile * d * es
    return pl.pallas_call(
        _resident_gather_kernel,
        out_shape=jax.ShapeDtypeStruct((n_pad, d), emb_table.dtype),
        grid_spec=pltpu.PrefetchScalarGridSpec(
            num_scalar_prefetch=1,                           # ids -> SMEM
            grid=(n_pad // t_tile,),
            in_specs=[pl.BlockSpec((v, d), lambda i, ids: (0, 0))],   # resident
            out_specs=pl.BlockSpec((t_tile, d), lambda i, ids: (i, 0)),
        ),
        compiler_params=pltpu.CompilerParams(
            dimension_semantics=("parallel",),
            vmem_limit_bytes=_vmem_limit(need),
        ),
    )(flat_ids_padded, emb_table)


def _embed_dma_gather(flat_ids_padded, emb_table, t_tile):
    n_pad = flat_ids_padded.shape[0]
    v, d = emb_table.shape
    es = emb_table.dtype.itemsize
    need = 3 * t_tile * d * es          # double-buffered output + gather scratch
    return pl.pallas_call(
        _dma_gather_kernel,
        out_shape=jax.ShapeDtypeStruct((n_pad, d), emb_table.dtype),
        grid_spec=pltpu.PrefetchScalarGridSpec(
            num_scalar_prefetch=1,                           # ids -> SMEM
            grid=(n_pad // t_tile,),
            in_specs=[pl.BlockSpec(memory_space=pl.ANY)],    # table stays in HBM
            out_specs=pl.BlockSpec((t_tile, d), lambda i, ids: (i, 0)),
            scratch_shapes=[
                pltpu.VMEM((t_tile, d), emb_table.dtype),
                pltpu.SemaphoreType.DMA((_DMA_GATHER_BUFFERS,)),
            ],
        ),
        compiler_params=pltpu.CompilerParams(
            dimension_semantics=("arbitrary",),
            vmem_limit_bytes=_vmem_limit(need),
        ),
    )(flat_ids_padded, emb_table)


def word_embedding_forward(idx, emb_table):
    """Pallas equivalent of WordEmbedding.forward.

    idx:       integer token ids, any shape (typically [B, L])
    emb_table: [V, D] embedding matrix (nn.Embedding.weight)
    returns:   idx.shape + (D,) embeddings
    """
    idx = jnp.asarray(idx)
    if idx.size == 0:
        # Mirror PyTorch's `if len(idx) == 0: idx = torch.tensor([1])` hack
        # (silent shape change, exactly like the original module).
        idx = jnp.array([1], dtype=jnp.int32)

    orig_shape = idx.shape
    v, d = emb_table.shape

    flat = idx.reshape(-1).astype(jnp.int32)
    flat = jnp.clip(flat, 0, v - 1)          # jnp.take semantics; no OOB DMAs
    n = flat.shape[0]

    t_tile = _pick_token_tile(n)
    n_pad = ((n + t_tile - 1) // t_tile) * t_tile
    flat_padded = jnp.pad(flat, (0, n_pad - n))   # pad with id 0; sliced off below

    table_bytes = v * d * emb_table.dtype.itemsize
    if v <= _ONE_HOT_MAX_VOCAB and table_bytes <= _RESIDENT_TABLE_MAX_BYTES:
        out_flat = _embed_onehot(flat_padded, emb_table, t_tile)
    elif table_bytes <= _RESIDENT_TABLE_MAX_BYTES:
        out_flat = _embed_resident_gather(flat_padded, emb_table, t_tile)
    else:
        out_flat = _embed_dma_gather(flat_padded, emb_table, t_tile)

    return out_flat[:n].reshape(orig_shape + (d,))


if __name__ == "__main__":
    key = jax.random.PRNGKey(0)
    k1, k2, k3, k4, k5, k6 = jax.random.split(key, 6)

    batch, seq_len, embedding_dim = 2, 8, 128

    # --- Test 1: module-default shapes (tiny vocab -> exact one-hot MXU path) --
    vocab1 = 64
    emb1 = jax.random.normal(k1, (vocab1, embedding_dim), dtype=jnp.float32)
    idx1 = jax.random.randint(k2, (batch, seq_len), 0, vocab1, dtype=jnp.int32)
    out1 = jax.block_until_ready(word_embedding_forward(idx1, emb1))
    ref1 = jnp.take(emb1, idx1, axis=0)
    assert out1.shape == (batch, seq_len, embedding_dim)
    assert jnp.allclose(out1, ref1, rtol=1e-6, atol=1e-6), "one-hot path mismatch"

    # --- Test 2: medium vocab (VMEM-resident fori_loop gather path) ------------
    vocab2 = 2048
    emb2 = jax.random.normal(k3, (vocab2, embedding_dim), dtype=jnp.float32)
    idx2 = jax.random.randint(k4, (batch, seq_len), 0, vocab2, dtype=jnp.int32)
    out2 = jax.block_until_ready(word_embedding_forward(idx2, emb2))
    ref2 = jnp.take(emb2, idx2, axis=0)
    assert out2.shape == (batch, seq_len, embedding_dim)
    assert jnp.allclose(out2, ref2, rtol=1e-6, atol=1e-6), \
        "resident-gather path mismatch"

    # --- Test 3: huge vocab (table > VMEM budget -> manual DMA gather path) ----
    vocab3 = 33024   # 33024 * 128 * 4 B ~ 16.1 MiB > resident threshold
    emb3 = jax.random.normal(k5, (vocab3, embedding_dim), dtype=jnp.float32)
    idx3 = jax.random.randint(k6, (batch, seq_len), 0, vocab3, dtype=jnp.int32)
    out3 = jax.block_until_ready(word_embedding_forward(idx3, emb3))
    ref3 = jnp.take(emb3, idx3, axis=0)
    assert out3.shape == (batch, seq_len, embedding_dim)
    assert jnp.allclose(out3, ref3, rtol=1e-6, atol=1e-6), \
        "DMA-gather path mismatch"

    print("KERNEL_OK")
</pallas_src>

<mosaic_0001>
module attributes {stable_mosaic.version = 11 : i64} {
  func.func @_onehot_embed_kernel(%arg0: i32, %arg1: memref<128x1xi32, #tpu.memory_space<vmem>>, %arg2: memref<64x128xbf16, #tpu.memory_space<vmem>>, %arg3: memref<64x128xbf16, #tpu.memory_space<vmem>>, %arg4: memref<64x128xbf16, #tpu.memory_space<vmem>>, %arg5: memref<128x128xf32, #tpu.memory_space<vmem>>) attributes {dimension_semantics = [#tpu.dimension_semantics<parallel>], iteration_bounds = array<i64: 1>, scalar_prefetch = 0 : i64, scratch_operands = 0 : i64, tpu.core_type = #tpu.core_type<tc>, window_params = [{transform_indices = @transform_0, window_bounds = array<i64: 128, 1>}, {pipeline_mode = #tpu.pipeline_mode<synchronous>, transform_indices = @transform_1, window_bounds = array<i64: 64, 128>}, {pipeline_mode = #tpu.pipeline_mode<synchronous>, transform_indices = @transform_2, window_bounds = array<i64: 64, 128>}, {pipeline_mode = #tpu.pipeline_mode<synchronous>, transform_indices = @transform_3, window_bounds = array<i64: 64, 128>}, {transform_indices = @transform_4, window_bounds = array<i64: 128, 128>}]} {
    %c0 = arith.constant 0 : index
    %c0_0 = arith.constant 0 : index
    %0 = vector.load %arg1[%c0, %c0_0] : memref<128x1xi32, #tpu.memory_space<vmem>>, vector<128x1xi32>
    %1 = tpu.iota {dimensions = array<i32: 1>} : vector<128x64xi32>
    %2 = vector.broadcast %0 : vector<128x1xi32> to vector<128x64xi32>
    %3 = arith.cmpi eq, %2, %1 : vector<128x64xi32>
    %4 = arith.extui %3 : vector<128x64xi1> to vector<128x64xi32>
    %5 = arith.sitofp %4 : vector<128x64xi32> to vector<128x64xf32>
    %6 = arith.truncf %5 : vector<128x64xf32> to vector<128x64xbf16>
    %c0_1 = arith.constant 0 : index
    %c0_2 = arith.constant 0 : index
    %7 = vector.load %arg2[%c0_1, %c0_2] : memref<64x128xbf16, #tpu.memory_space<vmem>>, vector<64x128xbf16>
    %cst = arith.constant dense<0.000000e+00> : vector<128x128xf32>
    %8 = tpu.matmul %6, %7, %cst {dimension_numbers = #tpu.dot_dimension_numbers<[1], [0], [0], [1], [0, 0, 1, 1], [], []>} : vector<128x64xbf16>, vector<64x128xbf16>, vector<128x128xf32> -> vector<128x128xf32>
    %c0_3 = arith.constant 0 : index
    %c0_4 = arith.constant 0 : index
    %9 = vector.load %arg3[%c0_3, %c0_4] : memref<64x128xbf16, #tpu.memory_space<vmem>>, vector<64x128xbf16>
    %cst_5 = arith.constant dense<0.000000e+00> : vector<128x128xf32>
    %10 = tpu.matmul %6, %9, %cst_5 {dimension_numbers = #tpu.dot_dimension_numbers<[1], [0], [0], [1], [0, 0, 1, 1], [], []>} : vector<128x64xbf16>, vector<64x128xbf16>, vector<128x128xf32> -> vector<128x128xf32>
    %11 = arith.addf %8, %10 : vector<128x128xf32>
    %c0_6 = arith.constant 0 : index
    %c0_7 = arith.constant 0 : index
    %12 = vector.load %arg4[%c0_6, %c0_7] : memref<64x128xbf16, #tpu.memory_space<vmem>>, vector<64x128xbf16>
    %cst_8 = arith.constant dense<0.000000e+00> : vector<128x128xf32>
    %13 = tpu.matmul %6, %12, %cst_8 {dimension_numbers = #tpu.dot_dimension_numbers<[1], [0], [0], [1], [0, 0, 1, 1], [], []>} : vector<128x64xbf16>, vector<64x128xbf16>, vector<128x128xf32> -> vector<128x128xf32>
    %14 = arith.addf %11, %13 : vector<128x128xf32>
    %c0_9 = arith.constant 0 : index
    %c0_10 = arith.constant 0 : index
    %15 = vector.load %arg5[%c0_9, %c0_10] : memref<128x128xf32, #tpu.memory_space<vmem>>, vector<128x128xf32>
    tpu.vector_store %arg5[%c0_9, %c0_10], %14 {strides = array<i32>} : memref<128x128xf32, #tpu.memory_space<vmem>>, vector<128x128xf32>,
    return
  }
  func.func @transform_0(%arg0: i32) -> (i32, i32) {
    %c0_i32 = arith.constant 0 : i32
    %c0_i32_0 = arith.constant 0 : i32
    return %arg0, %c0_i32 : i32, i32
  }
  func.func @transform_1(%arg0: i32) -> (i32, i32) {
    %c0_i32 = arith.constant 0 : i32
    %c0_i32_0 = arith.constant 0 : i32
    %c0_i32_1 = arith.constant 0 : i32
    return %c0_i32, %c0_i32_0 : i32, i32
  }
  func.func @transform_2(%arg0: i32) -> (i32, i32) {
    %c0_i32 = arith.constant 0 : i32
    %c0_i32_0 = arith.constant 0 : i32
    %c0_i32_1 = arith.constant 0 : i32
    return %c0_i32, %c0_i32_0 : i32, i32
  }
  func.func @transform_3(%arg0: i32) -> (i32, i32) {
    %c0_i32 = arith.constant 0 : i32
    %c0_i32_0 = arith.constant 0 : i32
    %c0_i32_1 = arith.constant 0 : i32
    return %c0_i32, %c0_i32_0 : i32, i32
  }
  func.func @transform_4(%arg0: i32) -> (i32, i32) {
    %c0_i32 = arith.constant 0 : i32
    %c0_i32_0 = arith.constant 0 : i32
    return %arg0, %c0_i32 : i32, i32
  }
}

</mosaic_0001>

<bundles_post_ra>
// kernel: tpu_custom_call.1
= control target key start
LH: loop header
LB: loop body
LE: loop exit
PB: predicated region body
PF: predicated region fallthrough
CT: control target
= control target key end

     0   :  { %v605_v2 = vmov 0   ;;  %s770_s0 = inlined_call_operand.vmem [shape: s32[128,1], index: 0, kind: input, shape index: {}]   ;;  %s771_s1 = inlined_call_operand.vmem [shape: bf16[64,128], index: 1, kind: input, shape index: {}]   ;;  %s772_s2 = inlined_call_operand.vmem [shape: bf16[64,128], index: 2, kind: input, shape index: {}]   ;;  %s773_s3 = inlined_call_operand.vmem [shape: bf16[64,128], index: 3, kind: input, shape index: {}]   ;;  %s774_s4 = inlined_call_operand.hbm [shape: f32[128,128], index: 4, kind: output, shape index: {}]  }
   0x1   :  { %v31_v0 = vld [vmem:[%s770_s0 + $0x60] sm:$0xff]  ;;  %577 = vset.pattern.permute.xlu1 %v605_v2  ;;  %576 = vset.pattern.permute.xlu0 %v605_v2  ;;  %v21_v3 = vld [vmem:[%s770_s0 + $0x10] sm:$0xff] }
   0x2   :  { %v19_v1 = vld [vmem:[%s770_s0] sm:$0xff]  ;;  %74 = vperm.xlu1 %577, %v31_v0   ;;  %578 = vset.pattern.permute.xlu2 %v605_v2 }
   0x3   :  { %38 = vperm.xlu0 %576, %v19_v1   ;;  %44 = vperm.xlu2 %578, %v21_v3  }
   0x4   :  { %9 = vsyncpa [#allocation3], 0  ;;  %v32_v4 = vld [vmem:[%s770_s0 + $0x68] sm:$0xff]  ;;  %v22_v6 = vld [vmem:[%s770_s0 + $0x18] sm:$0xff]  ;;  %v35_v32 = vlaneseq  ;;  %vm181_vm4 = vcmask 523264   ;;  %v606_v39 = vmov 0.0  }
   0x5   :  { %v20_v5 = vld [vmem:[%s770_s0 + $0x8] sm:$0xff]  ;;  %v34_v7 = vld [vmem:[%s770_s0 + $0x78] sm:$0xff]  ;;  %v33_v8 = vld [vmem:[%s770_s0 + $0x70] sm:$0xff]  ;;  %s447_s19 = sshll.u32 %s774_s4, 4  ;;  %s608_s20 = smov 128   ;;  %s448_s19 = int_to_ptr.hbm [resolvable:$true] %s447_s19 }
   0x6   :  { %v23_v9 = vld [vmem:[%s770_s0 + $0x20] sm:$0xff]  ;;  %v25_v10 = vld [vmem:[%s770_s0 + $0x30] sm:$0xff]  ;;  %v24_v11 = vld [vmem:[%s770_s0 + $0x28] sm:$0xff]  ;;  %v721_v36 = vand.u32 127, %v35_v32  ;;  %s609_s21 = smov 8  }
   0x7   :  { %v26_v12 = vld [vmem:[%s770_s0 + $0x38] sm:$0xff]  ;;  %v28_v13 = vld [vmem:[%s770_s0 + $0x48] sm:$0xff]  ;;  %v27_v14 = vld [vmem:[%s770_s0 + $0x40] sm:$0xff] }
   0x8   :  { %v29_v15 = vld [vmem:[%s770_s0 + $0x50] sm:$0xff]  ;;  %v30_v16 = vld [vmem:[%s770_s0 + $0x58] sm:$0xff]  ;;  %v552_v23 = vld [vmem:[%s772_s2 + $0x8] sm:$0xff] }
   0x9   :  { %v554_v17 = vld [vmem:[%s772_s2 + $0x18] sm:$0xff]  ;;  %v553_v20 = vld [vmem:[%s772_s2 + $0x10] sm:$0xff]  ;;  %v548_v24 = vld [vmem:[%s771_s1 + $0x8] sm:$0xff] }
   0xa   :  { %77 = vperm.xlu1 %577, %v32_v4   ;;  %v550_v18 = vld [vmem:[%s771_s1 + $0x18] sm:$0xff]  ;;  %210 = vmatpush.bf16.msra.mxu0 %v554_v17  ;;  %v549_v21 = vld [vmem:[%s771_s1 + $0x10] sm:$0xff]  ;;  %v556_v25 = vld [vmem:[%s773_s3 + $0x8] sm:$0xff] }
   0xb   :  { %41 = vperm.xlu0 %576, %v20_v5   ;;  %47 = vperm.xlu2 %578, %v22_v6   ;;  %v558_v19 = vld [vmem:[%s773_s3 + $0x18] sm:$0xff]  ;;  %v557_v22 = vld [vmem:[%s773_s3 + $0x10] sm:$0xff]  ;;  %v551_v26 = vld [vmem:[%s772_s2] sm:$0xff] }
   0xc   :  { %559 = vmatpush.bf16.msra.mxu3 %v554_v17  ;;  %283 = vmatpush.bf16.msra.mxu1 %v550_v18  ;;  %v547_v27 = vld [vmem:[%s771_s1] sm:$0xff]  ;;  %s607_s1 = smov [#allocation2]  }
   0xd   :  { %364 = vmatpush.bf16.msra.mxu2 %v558_v19  ;;  %v555_v28 = vld [vmem:[%s773_s3] sm:$0xff]  ;;  %s445_s2 = sshll.u32 %s607_s1, 4  ;;  %s446_s2 = int_to_ptr.vmem [resolvable:$true] %s445_s2 }
   0xe   :  { %211 = vmatpush.bf16.msra.mxu0 %v553_v20 }
  0x10   :  { %560 = vmatpush.bf16.msra.mxu3 %v553_v20  ;;  %284 = vmatpush.bf16.msra.mxu1 %v549_v21 }
  0x11   :  { %365 = vmatpush.bf16.msra.mxu2 %v557_v22 }
  0x12   :  { %83 = vperm.xlu1 %577, %v34_v7   ;;  %212 = vmatpush.bf16.msra.mxu0 %v552_v23 }
  0x13   :  { %80 = vperm.xlu0 %576, %v33_v8   ;;  %50 = vperm.xlu2 %578, %v23_v9  }
  0x14   :  { %561 = vmatpush.bf16.msra.mxu3 %v552_v23  ;;  %285 = vmatpush.bf16.msra.mxu1 %v548_v24 }
  0x15   :  { %366 = vmatpush.bf16.msra.mxu2 %v556_v25 }
  0x16   :  { %213 = vmatpush.bf16.msra.mxu0 %v551_v26 }
  0x18   :  { %562 = vmatpush.bf16.msra.mxu3 %v551_v26  ;;  %286 = vmatpush.bf16.msra.mxu1 %v547_v27 }
  0x19   :  { %367 = vmatpush.bf16.msra.mxu2 %v555_v28 }
  0x1a   :  { %56 = vperm.xlu1 %577, %v25_v10  }
  0x1b   :  { %53 = vperm.xlu0 %576, %v24_v11   ;;  %59 = vperm.xlu2 %578, %v26_v12  }
  0x1c   :  { %563 = vmatpush.bf16.msrb.mxu3 %v550_v18 }
  0x20   :  { %564 = vmatpush.bf16.msrb.mxu3 %v549_v21 }
  0x22   :  { %65 = vperm.xlu1 %577, %v28_v13  }
  0x23   :  { %62 = vperm.xlu0 %576, %v27_v14   ;;  %68 = vperm.xlu2 %578, %v29_v15  }
  0x24   :  { %565 = vmatpush.bf16.msrb.mxu3 %v548_v24 }
  0x28   :  { %566 = vmatpush.bf16.msrb.mxu3 %v547_v27 }
  0x2b   :  { %71 = vperm.xlu0 %576, %v30_v16  }
  0x5d   :  { %v45_v29 = vpop.permute.xlu2 %44 }
  0x5e   :  { %vm87_vm6 = vcmp.eq.s32.totalorder %v45_v29, %v721_v36 }
  0x5f   :  { %v461_v50 = vsel %vm87_vm6, 1.0, %v606_v39 }
  0x65   :  { %v48_v30 = vpop.permute.xlu2 %47 }
  0x66   :  { %vm88_vm7 = vcmp.eq.s32.totalorder %v48_v30, %v721_v36 }
  0x67   :  { %v462_v51 = vsel %vm88_vm7, 1.0, %v606_v39 }
  0x68   :  { %v134_v56 = vpack.c.bf16 %v462_v51, %v461_v50 }
  0x6d   :  { %v51_v31 = vpop.permute.xlu2 %50 }
  0x6e   :  { %vm89_vm13 = vcmp.eq.s32.totalorder %v51_v31, %v721_v36 }
  0x6f   :  { %v463_v1 = vsel %vm89_vm13, 1.0, %v606_v39 }
  0x74   :  { %v75_v33 = vpop.permute.xlu1 %74 }
  0x75   :  { %v39_v34 = vpop.permute.xlu0 %38  ;;  %v719_v35 = vpop.permute.xlu2 %59  ;;  %vm97_vm0 = vcmp.eq.s32.totalorder %v75_v33, %v721_v36 }
  0x76   :  { %vm85_vm1 = vcmp.eq.s32.totalorder %v39_v34, %v721_v36  ;;  %v471_v40 = vsel %vm97_vm0, 1.0, %v606_v39  ;;  %vm92_vm0 = vcmp.eq.s32.totalorder %v719_v35, %v721_v36 }
  0x77   :  { %v459_v41 = vsel %vm85_vm1, 1.0, %v606_v39  ;;  %v466_v6 = vsel %vm92_vm0, 1.0, %v606_v39 }
  0x7c   :  { %v78_v37 = vpop.permute.xlu1 %77 }
  0x7d   :  { %v42_v38 = vpop.permute.xlu0 %41  ;;  %vm98_vm2 = vcmp.eq.s32.totalorder %v78_v37, %v721_v36  ;;  %v69_v44 = vpop.permute.xlu2 %68 }
  0x7e   :  { %vm86_vm3 = vcmp.eq.s32.totalorder %v42_v38, %v721_v36  ;;  %v472_v42 = vsel %vm98_vm2, 1.0, %v606_v39  ;;  %vm95_vm5 = vcmp.eq.s32.totalorder %v69_v44, %v721_v36 }
  0x7f   :  { %v460_v43 = vsel %vm86_vm3, 1.0, %v606_v39  ;;  %v139_v45 = vpack.c.bf16 %v472_v42, %v471_v40  ;;  %v469_v47 = vsel %vm95_vm5, 1.0, %v606_v39 }
  0x80   :  { %v133_v46 = vpack.c.bf16 %v460_v43, %v459_v41 }
  0x81   :  { %497 = vmatmul.msk.bf16.vlgmr.msra.gmra.mxu3 %vm181_vm4, %v139_v45 }
  0x82   :  { %491 = vmatmul.msk.bf16.vlgmr.msra.gmra.mxu0 %vm181_vm4, %v133_v46  ;;  %515 = vmatmul.msk.bf16.vlgmr.msra.gmra.mxu1 %vm181_vm4, %v133_v46 }
  0x83   :  { %539 = vmatmul.msk.bf16.vlgmr.msra.gmra.mxu2 %vm181_vm4, %v133_v46  ;;  %567 = vmatpush.bf16.msra.mxu3 %v558_v19 }
  0x84   :  { %v84_v48 = vpop.permute.xlu1 %83 }
  0x85   :  { %v81_v49 = vpop.permute.xlu0 %80  ;;  %vm100_vm8 = vcmp.eq.s32.totalorder %v84_v48, %v721_v36 }
  0x86   :  { %vm99_vm9 = vcmp.eq.s32.totalorder %v81_v49, %v721_v36  ;;  %v474_v52 = vsel %vm100_vm8, 1.0, %v606_v39 }
  0x87   :  { %568 = vmatpush.bf16.msra.mxu3 %v557_v22  ;;  %v473_v53 = vsel %vm99_vm9, 1.0, %v606_v39 }
  0x88   :  { %v140_v57 = vpack.c.bf16 %v474_v52, %v473_v53 }
  0x8b   :  { %569 = vmatpush.bf16.msra.mxu3 %v556_v25 }
  0x8c   :  { %v57_v54 = vpop.permute.xlu1 %56 }
  0x8d   :  { %v54_v55 = vpop.permute.xlu0 %53  ;;  %vm91_vm15 = vcmp.eq.s32.totalorder %v57_v54, %v721_v36 }
  0x8e   :  { %vm90_vm12 = vcmp.eq.s32.totalorder %v54_v55, %v721_v36  ;;  %v465_v5 = vsel %vm91_vm15, 1.0, %v606_v39 }
  0x8f   :  { %570 = vmatpush.bf16.msra.mxu3 %v555_v28  ;;  %v464_v63 = vsel %vm90_vm12, 1.0, %v606_v39  ;;  %v136_v7 = vpack.c.bf16 %v466_v6, %v465_v5 }
  0x90   :  { %v135_v3 = vpack.c.bf16 %v464_v63, %v463_v1 }
  0x91   :  { %498 = vmatmul.msk.bf16.gmra.mxu3 %vm181_vm4, %v140_v57 }
  0x92   :  { %492 = vmatmul.msk.bf16.gmra.mxu0 %vm181_vm4, %v134_v56  ;;  %516 = vmatmul.msk.bf16.gmra.mxu1 %vm181_vm4, %v134_v56 }
  0x93   :  { %540 = vmatmul.msk.bf16.gmra.mxu2 %vm181_vm4, %v134_v56 }
  0x94   :  { %v66_v58 = vpop.permute.xlu1 %65 }
  0x95   :  { %v63_v59 = vpop.permute.xlu0 %62  ;;  %vm94_vm10 = vcmp.eq.s32.totalorder %v66_v58, %v721_v36 }
  0x96   :  { %vm93_vm11 = vcmp.eq.s32.totalorder %v63_v59, %v721_v36  ;;  %v468_v60 = vsel %vm94_vm10, 1.0, %v606_v39 }
  0x97   :  { %v467_v61 = vsel %vm93_vm11, 1.0, %v606_v39 }
  0x98   :  { %v137_v62 = vpack.c.bf16 %v468_v60, %v467_v61 }
  0x9d   :  { %v72_v0 = vpop.permute.xlu0 %71 }
  0x9e   :  { %vm96_vm14 = vcmp.eq.s32.totalorder %v72_v0, %v721_v36 }
  0x9f   :  { %v470_v2 = vsel %vm96_vm14, 1.0, %v606_v39 }
  0xa0   :  { %v138_v4 = vpack.c.bf16 %v470_v2, %v469_v47 }
  0xa1   :  { %521 = vmatmul.msk.bf16.vlgmr.msrb.gmra.mxu3 %vm181_vm4, %v139_v45 }
  0xa2   :  { %493 = vmatmul.msk.bf16.gmra.mxu0 %vm181_vm4, %v135_v3  ;;  %517 = vmatmul.msk.bf16.gmra.mxu1 %vm181_vm4, %v135_v3 }
  0xa3   :  { %541 = vmatmul.msk.bf16.gmra.mxu2 %vm181_vm4, %v135_v3 }
  0xb1   :  { %522 = vmatmul.msk.bf16.gmra.mxu3 %vm181_vm4, %v140_v57 }
  0xb2   :  { %494 = vmatmul.msk.bf16.gmra.mxu0 %vm181_vm4, %v136_v7  ;;  %518 = vmatmul.msk.bf16.gmra.mxu1 %vm181_vm4, %v136_v7 }
  0xb3   :  { %542 = vmatmul.msk.bf16.gmra.mxu2 %vm181_vm4, %v136_v7 }
  0xc1   :  { %545 = vmatmul.msk.bf16.vlgmr.msra.gmra.mxu3 %vm181_vm4, %v139_v45 }
  0xc2   :  { %495 = vmatmul.msk.bf16.gmra.mxu0 %vm181_vm4, %v137_v62  ;;  %519 = vmatmul.msk.bf16.gmra.mxu1 %vm181_vm4, %v137_v62 }
  0xc3   :  { %543 = vmatmul.msk.bf16.gmra.mxu2 %vm181_vm4, %v137_v62 }
  0xd1   :  { %546 = vmatmul.msk.bf16.gmra.mxu3 %vm181_vm4, %v140_v57 }
  0xd2   :  { %496 = vmatmul.msk.bf16.gmra.mxu0 %vm181_vm4, %v138_v4  ;;  %520 = vmatmul.msk.bf16.gmra.mxu1 %vm181_vm4, %v138_v4 }
  0xd3   :  { %544 = vmatmul.msk.bf16.gmra.mxu2 %vm181_vm4, %v138_v4 }
  0xff   :  { %v215_v8 = vpop.f32.mrf.mxu0  ;;  %v288_v9 = vpop.f32.mrf.mxu1 }
 0x100   :  { %v289_v10 = vadd.f32 %v288_v9, %v215_v8 }
 0x104   :  { %v245_v11 = vpop.f32.mrf.mxu3 }
 0x106   :  { %v369_v12 = vpop.f32.mrf.mxu2 }
 0x107   :  { %v409_v13 = vadd.f32 %v369_v12, %v289_v10  ;;  %v217_v14 = vpop.f32.mrf.mxu0  ;;  %v290_v15 = vpop.f32.mrf.mxu1 }
 0x108   :  { %v291_v16 = vadd.f32 %v290_v15, %v217_v14 }
 0x109   :  { %425 = vst [vmem:[#allocation2] sm:$0xff] %v409_v13 }
 0x10c   :  { %v247_v17 = vpop.f32.mrf.mxu3 }
 0x10e   :  { %v371_v18 = vpop.f32.mrf.mxu2 }
 0x10f   :  { %v410_v19 = vadd.f32 %v371_v18, %v291_v16  ;;  %v220_v20 = vpop.f32.mrf.mxu0  ;;  %v293_v21 = vpop.f32.mrf.mxu1 }
 0x110   :  { %v294_v22 = vadd.f32 %v293_v21, %v220_v20 }
 0x111   :  { %426 = vst [vmem:[#allocation2 + $0x8] sm:$0xff] %v410_v19 }
 0x114   :  { %v250_v23 = vpop.f32.mrf.mxu3 }
 0x116   :  { %v374_v24 = vpop.f32.mrf.mxu2 }
 0x117   :  { %v411_v25 = vadd.f32 %v374_v24, %v294_v22  ;;  %v222_v26 = vpop.f32.mrf.mxu0  ;;  %v295_v27 = vpop.f32.mrf.mxu1 }
 0x118   :  { %v296_v28 = vadd.f32 %v295_v27, %v222_v26 }
 0x119   :  { %427 = vst [vmem:[#allocation2 + $0x10] sm:$0xff] %v411_v25 }
 0x11c   :  { %v764_v29 = vpop.f32.mrf.mxu3 }
 0x11e   :  { %v376_v30 = vpop.f32.mrf.mxu2 }
 0x11f   :  { %v412_v31 = vadd.f32 %v376_v30, %v296_v28  ;;  %v225_v32 = vpop.f32.mrf.mxu0  ;;  %v298_v33 = vpop.f32.mrf.mxu1 }
 0x120   :  { %v299_v34 = vadd.f32 %v298_v33, %v225_v32 }
 0x121   :  { %428 = vst [vmem:[#allocation2 + $0x18] sm:$0xff] %v412_v31 }
 0x124   :  { %v318_v35 = vpop.f32.mrf.mxu3 }
 0x125   :  { %v319_v58 = vadd.f32 %v318_v35, %v245_v11 }
 0x126   :  { %v379_v36 = vpop.f32.mrf.mxu2 }
 0x127   :  { %v413_v37 = vadd.f32 %v379_v36, %v299_v34  ;;  %v227_v38 = vpop.f32.mrf.mxu0  ;;  %v300_v39 = vpop.f32.mrf.mxu1 }
 0x128   :  { %v301_v40 = vadd.f32 %v300_v39, %v227_v38 }
 0x129   :  { %429 = vst [vmem:[#allocation2 + $0x20] sm:$0xff] %v413_v37 }
 0x12c   :  { %v320_v41 = vpop.f32.mrf.mxu3 }
 0x12d   :  { %v321_v2 = vadd.f32 %v320_v41, %v247_v17 }
 0x12e   :  { %v381_v42 = vpop.f32.mrf.mxu2 }
 0x12f   :  { %v414_v43 = vadd.f32 %v381_v42, %v301_v40  ;;  %v230_v44 = vpop.f32.mrf.mxu0  ;;  %v303_v45 = vpop.f32.mrf.mxu1 }
 0x130   :  { %v304_v46 = vadd.f32 %v303_v45, %v230_v44 }
 0x131   :  { %430 = vst [vmem:[#allocation2 + $0x28] sm:$0xff] %v414_v43 }
 0x134   :  { %v323_v47 = vpop.f32.mrf.mxu3 }
 0x135   :  { %v324_v10 = vadd.f32 %v323_v47, %v250_v23 }
 0x136   :  { %v384_v48 = vpop.f32.mrf.mxu2 }
 0x137   :  { %v415_v49 = vadd.f32 %v384_v48, %v304_v46  ;;  %v232_v50 = vpop.f32.mrf.mxu0  ;;  %v305_v51 = vpop.f32.mrf.mxu1 }
 0x138   :  { %v306_v52 = vadd.f32 %v305_v51, %v232_v50 }
 0x139   :  { %431 = vst [vmem:[#allocation2 + $0x30] sm:$0xff] %v415_v49 }
 0x13c   :  { %v325_v53 = vpop.f32.mrf.mxu3 }
 0x13d   :  { %v326_v17 = vadd.f32 %v325_v53, %v764_v29 }
 0x13e   :  { %v386_v54 = vpop.f32.mrf.mxu2 }
 0x13f   :  { %v416_v55 = vadd.f32 %v386_v54, %v306_v52  ;;  %v235_v56 = vpop.f32.mrf.mxu0  ;;  %v308_v57 = vpop.f32.mrf.mxu1 }
 0x140   :  { %v309_v59 = vadd.f32 %v308_v57, %v235_v56 }
 0x141   :  { %432 = vst [vmem:[#allocation2 + $0x38] sm:$0xff] %v416_v55 }
 0x144   :  { %v399_v60 = vpop.f32.mrf.mxu3 }
 0x145   :  { %v421_v62 = vadd.f32 %v399_v60, %v319_v58 }
 0x146   :  { %v389_v61 = vpop.f32.mrf.mxu2 }
 0x147   :  { %v417_v63 = vadd.f32 %v389_v61, %v309_v59  ;;  %v237_v0 = vpop.f32.mrf.mxu0  ;;  %437 = vst [vmem:[#allocation2 + $0x60] sm:$0xff] %v421_v62  ;;  %v310_v1 = vpop.f32.mrf.mxu1 }
 0x148   :  { %v311_v3 = vadd.f32 %v310_v1, %v237_v0 }
 0x149   :  { %433 = vst [vmem:[#allocation2 + $0x40] sm:$0xff] %v417_v63 }
 0x14c   :  { %v401_v4 = vpop.f32.mrf.mxu3 }
 0x14d   :  { %v422_v6 = vadd.f32 %v401_v4, %v321_v2 }
 0x14e   :  { %v391_v5 = vpop.f32.mrf.mxu2 }
 0x14f   :  { %v418_v7 = vadd.f32 %v391_v5, %v311_v3  ;;  %438 = vst [vmem:[#allocation2 + $0x68] sm:$0xff] %v422_v6  ;;  %v240_v8 = vpop.f32.mrf.mxu0  ;;  %v313_v9 = vpop.f32.mrf.mxu1 }
 0x150   :  { %v314_v11 = vadd.f32 %v313_v9, %v240_v8 }
 0x151   :  { %434 = vst [vmem:[#allocation2 + $0x48] sm:$0xff] %v418_v7 }
 0x154   :  { %v404_v12 = vpop.f32.mrf.mxu3 }
 0x155   :  { %v423_v14 = vadd.f32 %v404_v12, %v324_v10 }
 0x156   :  { %v394_v13 = vpop.f32.mrf.mxu2 }
 0x157   :  { %v419_v15 = vadd.f32 %v394_v13, %v314_v11  ;;  %439 = vst [vmem:[#allocation2 + $0x70] sm:$0xff] %v423_v14  ;;  %v242_v16 = vpop.f32.mrf.mxu0  ;;  %v315_v18 = vpop.f32.mrf.mxu1 }
 0x158   :  { %v316_v19 = vadd.f32 %v315_v18, %v242_v16 }
 0x159   :  { %435 = vst [vmem:[#allocation2 + $0x50] sm:$0xff] %v419_v15 }
 0x15c   :  { %v406_v20 = vpop.f32.mrf.mxu3 }
 0x15d   :  { %v424_v22 = vadd.f32 %v406_v20, %v326_v17 }
 0x15e   :  { %v396_v21 = vpop.f32.mrf.mxu2 }
 0x15f   :  { %v420_v23 = vadd.f32 %v396_v21, %v316_v19  ;;  %440 = vst [vmem:[#allocation2 + $0x78] sm:$0xff] %v424_v22 }
 0x161   :  { %436 = vst [vmem:[#allocation2 + $0x58] sm:$0xff] %v420_v23 }
 0x162   :  { %453 = dma.vmem_to_hbm [thread:$0]  %s446_s2, 2048, %s448_s19, [#allocation3], %s608_s20, %s608_s20, %s609_s21  }
 0x163   :  { %603 = dma.done.wait [#allocation3], 2048  }
 0x164   :  { %604 = vsyncadd [#allocation3], 4294965248 }
 0x165   :  { %458 = vsyncpa [#allocation3], 1 }

</bundles_post_ra>
